<compile_context>
chip_gen: v7x
topology: tpu7x:2x2x1
jax: 0.10.0
libtpu: 0.0.40
codegen_flags: <defaults>
</compile_context>

<pallas_src>
import functools

import jax
import jax.numpy as jnp
from jax.experimental import pallas as pl
from jax.experimental.pallas import tpu as pltpu

BN_EPS = 1e-5      # torch.nn.BatchNorm1d default eps
_LANE = 128        # vreg lane width -> feature dims padded to multiples of this


def _round_up(x, m):
    return ((x + m - 1) // m) * m


def _size_to_hidden_kernel(n_hidden, n_ref, x_ref, w_ref, vec_ref, out_ref):
    """n_ref   : (1,)               int32 SMEM  runtime valid-row count
       x_ref   : (B_pad, D)         f32         activations (padded entries 0)
       w_ref   : (n_hidden+1, D, D) bf16        weights, pre-transposed (in, out)
       vec_ref : (R_pad, D)         f32         rows = [gamma, beta]*n_hidden + [b_out]
       out_ref : (B_pad, D)         f32
    All feature dims share one lane-dense padded width D (multiple of 128)."""
    x = x_ref[...]                                           # (B_pad, D) f32
    B_pad = x.shape[0]
    mxu_dtype = w_ref.dtype

    # Runtime batch size -> row mask + exact 1/n (all in vector space).
    n_valid = n_ref[0]
    row_mask = (jax.lax.broadcasted_iota(jnp.int32, (B_pad, 1), 0)
                < n_valid).astype(jnp.float32)               # (B_pad, 1)
    n_f = jnp.broadcast_to(n_valid.astype(jnp.float32), (1, 1))
    inv_n = pl.reciprocal(n_f, approx=False)                 # (1, 1)

    for i in range(n_hidden):                                # static unroll
        g = vec_ref[2 * i: 2 * i + 1, :]                     # (1, D)
        beta = vec_ref[2 * i + 1: 2 * i + 2, :]              # (1, D)

        # Linear on the MXU (bf16 operands, f32 accumulation).  The Linear bias
        # is dropped: it is exactly cancelled by the BN mean subtraction.
        y = jnp.dot(x.astype(mxu_dtype), w_ref[i],
                    preferred_element_type=jnp.float32)      # (B_pad, D) f32

        # Train-mode BatchNorm1d: biased batch statistics over the real rows
        # only (padded rows masked out).
        mean = jnp.sum(y * row_mask, axis=0, keepdims=True) * inv_n   # (1, D)
        d = (y - mean) * row_mask
        var = jnp.sum(d * d, axis=0, keepdims=True) * inv_n           # (1, D)

        # Fold BN into one per-feature scale + shift (computed at (1, D)).
        s = g * jax.lax.rsqrt(var + BN_EPS)                  # rsqrt -> EUP slot
        t = beta - mean * s
        x = jnp.maximum(y * s + t, 0.0)                      # 2 VPU ops + ReLU

    b_out = vec_ref[2 * n_hidden: 2 * n_hidden + 1, :]       # (1, D)
    out = jnp.dot(x.astype(mxu_dtype), w_ref[n_hidden],
                  preferred_element_type=jnp.float32) + b_out
    out_ref[...] = out.astype(out_ref.dtype)


def pack_params(params, input_size, hidden_size, mxu_dtype=jnp.bfloat16):
    """Run ONCE at init.  Pads every feature dim to a common lane-dense width D
    (multiple of 128; use 256-multiples on v6e/v7x once dims grow past 128) and
    packs parameters into two slabs:
      w_stack : (n_hidden+1, D, D) mxu_dtype, weights pre-transposed to (in, out)
      vec     : (R_pad, D) f32, rows = [gamma_i, beta_i]*n_hidden + [b_out]
    Hidden-layer Linear biases are intentionally NOT packed (cancelled by BN)."""
    n_hidden = len(params["w"])
    dims = [input_size] + [w.shape[1] for w in params["w"]] + [hidden_size]
    D = max(_round_up(d, _LANE) for d in dims)

    all_w = list(params["w"]) + [params["w_out"]]
    w_stack = jnp.stack([
        jnp.pad(w.astype(jnp.float32),
                ((0, D - w.shape[0]), (0, D - w.shape[1])))
        for w in all_w
    ]).astype(mxu_dtype)                                     # (n_hidden+1, D, D)

    rows = []
    for i in range(n_hidden):
        for v in (params["gamma"][i], params["beta"][i]):
            rows.append(jnp.pad(v.astype(jnp.float32), (0, D - v.shape[0])))
    rows.append(jnp.pad(params["b_out"].astype(jnp.float32),
                        (0, D - params["b_out"].shape[0])))
    vec = jnp.stack(rows)                                    # (2*n_hidden+1, D)
    vec = jnp.pad(vec, ((0, _round_up(vec.shape[0], 8) - vec.shape[0]), (0, 0)))
    return {"w_stack": w_stack, "vec": vec}


@functools.partial(jax.jit, static_argnames=("n_layer", "hidden_size"))
def size_to_hidden_forward(x, w_stack, vec, *, n_layer, hidden_size):
    """x: (B, input_size) f32.  w_stack / vec come from pack_params (cached at
    init).  Returns (n_layer, B, hidden_size) f32 (a broadcast view of the 2-D
    result, matching x.unsqueeze(0).repeat(n_layer, 1, 1))."""
    n_hidden = w_stack.shape[0] - 1
    D = w_stack.shape[-1]
    B, F = x.shape

    # dtype-aware batch pad: bf16 min tile is (16, 128), f32 is (8, 128).
    sublane = max(8, 32 // w_stack.dtype.itemsize)
    B_pad = _round_up(max(B, sublane), sublane)
    x_pad = jnp.pad(x.astype(jnp.float32), ((0, B_pad - B), (0, D - F)))

    # Runtime valid-row count (SMEM scalar) -> the kernel trace does not bake
    # in the logical batch size, only the padded bucket shape.
    n_valid = jnp.full((1,), B, dtype=jnp.int32)

    kernel = functools.partial(_size_to_hidden_kernel, n_hidden)
    bytes_accessed = (x_pad.size * 4
                      + w_stack.size * w_stack.dtype.itemsize
                      + vec.size * 4
                      + B_pad * D * 4)
    cost = pl.CostEstimate(flops=2 * B_pad * D * D * (n_hidden + 1),
                           transcendentals=n_hidden * D,
                           bytes_accessed=int(bytes_accessed))

    out_pad = pl.pallas_call(
        kernel,
        out_shape=jax.ShapeDtypeStruct((B_pad, D), jnp.float32),
        in_specs=[
            pl.BlockSpec(memory_space=pltpu.MemorySpace.SMEM),   # n_valid
            pl.BlockSpec(memory_space=pltpu.MemorySpace.VMEM),   # x_pad
            pl.BlockSpec(memory_space=pltpu.MemorySpace.VMEM),   # w_stack
            pl.BlockSpec(memory_space=pltpu.MemorySpace.VMEM),   # vec slab
        ],
        out_specs=pl.BlockSpec(memory_space=pltpu.MemorySpace.VMEM),
        cost_estimate=cost,
    )(n_valid, x_pad, w_stack, vec)

    out2d = out_pad[:B, :hidden_size]
    # Broadcast view instead of tile: no n_layer-fold HBM write amplification.
    return jnp.broadcast_to(out2d[None, :, :], (n_layer, B, hidden_size))


def init_params(key, input_size, hidden_dims, hidden_size):
    """PyTorch-style Linear init (U[-1/sqrt(in), 1/sqrt(in)]), BN gamma=1,
    beta=0.  Weights stored pre-transposed to (in, out).  Hidden biases are
    created (as in the PyTorch module) but the kernel drops them -- they are
    exactly cancelled by the train-mode BatchNorm mean subtraction."""
    params = {"w": [], "b": [], "gamma": [], "beta": []}
    in_dim = input_size
    for h in hidden_dims:
        key, kw, kb = jax.random.split(key, 3)
        bound = 1.0 / float(in_dim) ** 0.5
        params["w"].append(
            jax.random.uniform(kw, (in_dim, h), jnp.float32, -bound, bound))
        params["b"].append(
            jax.random.uniform(kb, (h,), jnp.float32, -bound, bound))
        params["gamma"].append(jnp.ones((h,), jnp.float32))
        params["beta"].append(jnp.zeros((h,), jnp.float32))
        in_dim = h
    key, kw, kb = jax.random.split(key, 3)
    bound = 1.0 / float(in_dim) ** 0.5
    params["w_out"] = jax.random.uniform(
        kw, (in_dim, hidden_size), jnp.float32, -bound, bound)
    params["b_out"] = jax.random.uniform(
        kb, (hidden_size,), jnp.float32, -bound, bound)
    return params


def reference_forward(x, params, n_layer, hidden_size, mxu_dtype=jnp.bfloat16):
    """Pure-JAX reference mirroring the PyTorch module's structure (hidden
    biases included, unfolded BN) with the same bf16 MXU operand precision, so
    the comparison isolates the kernel's structural simplifications."""
    h = x.astype(jnp.float32)
    for w, b, g, beta in zip(params["w"], params["b"],
                             params["gamma"], params["beta"]):
        y = jnp.dot(h.astype(mxu_dtype), w.astype(mxu_dtype),
                    preferred_element_type=jnp.float32) + b
        mean = jnp.mean(y, axis=0, keepdims=True)
        var = jnp.mean((y - mean) ** 2, axis=0, keepdims=True)
        y = (y - mean) * jax.lax.rsqrt(var + BN_EPS) * g + beta
        h = jnp.maximum(y, 0.0)
    out = jnp.dot(h.astype(mxu_dtype), params["w_out"].astype(mxu_dtype),
                  preferred_element_type=jnp.float32) + params["b_out"]
    return jnp.broadcast_to(out[None, :, :], (n_layer, x.shape[0], hidden_size))


if __name__ == "__main__":
    # Small shapes consistent with the module's forward:
    # x: (batch, input_size); output: (n_layer, batch, hidden_size)
    n_layer = 3
    hidden_size = 32
    input_size = 16
    hidden_dims = [32, 64]
    batch = 8

    key = jax.random.PRNGKey(0)
    key, kx = jax.random.split(key)
    x = jax.random.normal(kx, (batch, input_size), jnp.float32)
    params = init_params(key, input_size, hidden_dims, hidden_size)

    # Pack/pad/convert parameters ONCE (not in the per-call path).
    packed = pack_params(params, input_size, hidden_size)

    out = size_to_hidden_forward(x, packed["w_stack"], packed["vec"],
                                 n_layer=n_layer, hidden_size=hidden_size)
    out = jax.block_until_ready(out)

    ref = reference_forward(x, params, n_layer, hidden_size)
    assert out.shape == (n_layer, batch, hidden_size), out.shape
    max_err = float(jnp.max(jnp.abs(out - ref)))
    assert jnp.allclose(out, ref, atol=2e-3, rtol=2e-3), max_err

    print("KERNEL_OK")
</pallas_src>

<mosaic_0001>
module attributes {stable_mosaic.version = 11 : i64} {
  func.func @_size_to_hidden_kernel(%arg0: memref<1xi32, #tpu.memory_space<smem>>, %arg1: memref<16x128xf32, #tpu.memory_space<vmem>>, %arg2: memref<3x128x128xbf16, #tpu.memory_space<vmem>>, %arg3: memref<8x128xf32, #tpu.memory_space<vmem>>, %arg4: memref<16x128xf32, #tpu.memory_space<vmem>>) attributes {dimension_semantics = [], scalar_prefetch = 0 : i64, scratch_operands = 0 : i64, tpu.core_type = #tpu.core_type<tc>} {
    %c0 = arith.constant 0 : index
    %c0_0 = arith.constant 0 : index
    %0 = vector.load %arg1[%c0, %c0_0] : memref<16x128xf32, #tpu.memory_space<vmem>>, vector<16x128xf32>
    %c0_1 = arith.constant 0 : index
    %1 = memref.load %arg0[%c0_1] : memref<1xi32, #tpu.memory_space<smem>>
    %2 = tpu.iota {dimensions = array<i32: 0>} : vector<16x1xi32>
    %3 = vector.broadcast %1 : i32 to vector<16x1xi32>
    %4 = arith.cmpi slt, %2, %3 : vector<16x1xi32>
    %5 = arith.extui %4 : vector<16x1xi1> to vector<16x1xi32>
    %6 = arith.sitofp %5 : vector<16x1xi32> to vector<16x1xf32>
    %7 = arith.sitofp %1 : i32 to f32
    %8 = vector.broadcast %7 : f32 to vector<1x1xf32>
    %9 = tpu.reciprocal %8 : vector<1x1xf32> -> vector<1x1xf32>
    %c0_2 = arith.constant 0 : index
    %c0_3 = arith.constant 0 : index
    %10 = vector.load %arg3[%c0_2, %c0_3] : memref<8x128xf32, #tpu.memory_space<vmem>>, vector<1x128xf32>
    %c1 = arith.constant 1 : index
    %c0_4 = arith.constant 0 : index
    %11 = vector.load %arg3[%c1, %c0_4] : memref<8x128xf32, #tpu.memory_space<vmem>>, vector<1x128xf32>
    %12 = arith.truncf %0 : vector<16x128xf32> to vector<16x128xbf16>
    %c0_5 = arith.constant 0 : index
    %c0_6 = arith.constant 0 : index
    %c0_7 = arith.constant 0 : index
    %13 = vector.load %arg2[%c0_5, %c0_6, %c0_7] : memref<3x128x128xbf16, #tpu.memory_space<vmem>>, vector<1x128x128xbf16>
    %14 = vector.shape_cast %13 : vector<1x128x128xbf16> to vector<128x128xbf16>
    %cst = arith.constant dense<0.000000e+00> : vector<16x128xf32>
    %15 = tpu.matmul %12, %14, %cst {dimension_numbers = #tpu.dot_dimension_numbers<[1], [0], [0], [1], [0, 0, 1, 1], [], []>} : vector<16x128xbf16>, vector<128x128xbf16>, vector<16x128xf32> -> vector<16x128xf32>
    %16 = vector.broadcast %6 : vector<16x1xf32> to vector<16x128xf32>
    %17 = arith.mulf %15, %16 : vector<16x128xf32>
    %cst_8 = arith.constant dense<0.000000e+00> : vector<128xf32>
    %18 = vector.multi_reduction <add>, %17, %cst_8 [0] : vector<16x128xf32> to vector<128xf32>
    %19 = vector.shape_cast %18 : vector<128xf32> to vector<1x128xf32>
    %20 = vector.broadcast %9 : vector<1x1xf32> to vector<1x128xf32>
    %21 = arith.mulf %19, %20 : vector<1x128xf32>
    %22 = vector.broadcast %21 : vector<1x128xf32> to vector<16x128xf32>
    %23 = arith.subf %15, %22 : vector<16x128xf32>
    %24 = vector.broadcast %6 : vector<16x1xf32> to vector<16x128xf32>
    %25 = arith.mulf %23, %24 : vector<16x128xf32>
    %26 = arith.mulf %25, %25 : vector<16x128xf32>
    %cst_9 = arith.constant dense<0.000000e+00> : vector<128xf32>
    %27 = vector.multi_reduction <add>, %26, %cst_9 [0] : vector<16x128xf32> to vector<128xf32>
    %28 = vector.shape_cast %27 : vector<128xf32> to vector<1x128xf32>
    %29 = vector.broadcast %9 : vector<1x1xf32> to vector<1x128xf32>
    %30 = arith.mulf %28, %29 : vector<1x128xf32>
    %cst_10 = arith.constant 9.99999974E-6 : f32
    %31 = vector.broadcast %cst_10 : f32 to vector<1x128xf32>
    %32 = arith.addf %30, %31 : vector<1x128xf32>
    %33 = math.rsqrt %32 : vector<1x128xf32>
    %34 = arith.mulf %10, %33 : vector<1x128xf32>
    %35 = arith.mulf %21, %34 : vector<1x128xf32>
    %36 = arith.subf %11, %35 : vector<1x128xf32>
    %37 = vector.broadcast %34 : vector<1x128xf32> to vector<16x128xf32>
    %38 = arith.mulf %15, %37 : vector<16x128xf32>
    %39 = vector.broadcast %36 : vector<1x128xf32> to vector<16x128xf32>
    %40 = arith.addf %38, %39 : vector<16x128xf32>
    %cst_11 = arith.constant 0.000000e+00 : f32
    %41 = vector.broadcast %cst_11 : f32 to vector<16x128xf32>
    %42 = arith.maximumf %40, %41 : vector<16x128xf32>
    %c2 = arith.constant 2 : index
    %c0_12 = arith.constant 0 : index
    %43 = vector.load %arg3[%c2, %c0_12] : memref<8x128xf32, #tpu.memory_space<vmem>>, vector<1x128xf32>
    %c3 = arith.constant 3 : index
    %c0_13 = arith.constant 0 : index
    %44 = vector.load %arg3[%c3, %c0_13] : memref<8x128xf32, #tpu.memory_space<vmem>>, vector<1x128xf32>
    %45 = arith.truncf %42 : vector<16x128xf32> to vector<16x128xbf16>
    %c1_14 = arith.constant 1 : index
    %c0_15 = arith.constant 0 : index
    %c0_16 = arith.constant 0 : index
    %46 = vector.load %arg2[%c1_14, %c0_15, %c0_16] : memref<3x128x128xbf16, #tpu.memory_space<vmem>>, vector<1x128x128xbf16>
    %47 = vector.shape_cast %46 : vector<1x128x128xbf16> to vector<128x128xbf16>
    %cst_17 = arith.constant dense<0.000000e+00> : vector<16x128xf32>
    %48 = tpu.matmul %45, %47, %cst_17 {dimension_numbers = #tpu.dot_dimension_numbers<[1], [0], [0], [1], [0, 0, 1, 1], [], []>} : vector<16x128xbf16>, vector<128x128xbf16>, vector<16x128xf32> -> vector<16x128xf32>
    %49 = vector.broadcast %6 : vector<16x1xf32> to vector<16x128xf32>
    %50 = arith.mulf %48, %49 : vector<16x128xf32>
    %cst_18 = arith.constant dense<0.000000e+00> : vector<128xf32>
    %51 = vector.multi_reduction <add>, %50, %cst_18 [0] : vector<16x128xf32> to vector<128xf32>
    %52 = vector.shape_cast %51 : vector<128xf32> to vector<1x128xf32>
    %53 = vector.broadcast %9 : vector<1x1xf32> to vector<1x128xf32>
    %54 = arith.mulf %52, %53 : vector<1x128xf32>
    %55 = vector.broadcast %54 : vector<1x128xf32> to vector<16x128xf32>
    %56 = arith.subf %48, %55 : vector<16x128xf32>
    %57 = vector.broadcast %6 : vector<16x1xf32> to vector<16x128xf32>
    %58 = arith.mulf %56, %57 : vector<16x128xf32>
    %59 = arith.mulf %58, %58 : vector<16x128xf32>
    %cst_19 = arith.constant dense<0.000000e+00> : vector<128xf32>
    %60 = vector.multi_reduction <add>, %59, %cst_19 [0] : vector<16x128xf32> to vector<128xf32>
    %61 = vector.shape_cast %60 : vector<128xf32> to vector<1x128xf32>
    %62 = vector.broadcast %9 : vector<1x1xf32> to vector<1x128xf32>
    %63 = arith.mulf %61, %62 : vector<1x128xf32>
    %cst_20 = arith.constant 9.99999974E-6 : f32
    %64 = vector.broadcast %cst_20 : f32 to vector<1x128xf32>
    %65 = arith.addf %63, %64 : vector<1x128xf32>
    %66 = math.rsqrt %65 : vector<1x128xf32>
    %67 = arith.mulf %43, %66 : vector<1x128xf32>
    %68 = arith.mulf %54, %67 : vector<1x128xf32>
    %69 = arith.subf %44, %68 : vector<1x128xf32>
    %70 = vector.broadcast %67 : vector<1x128xf32> to vector<16x128xf32>
    %71 = arith.mulf %48, %70 : vector<16x128xf32>
    %72 = vector.broadcast %69 : vector<1x128xf32> to vector<16x128xf32>
    %73 = arith.addf %71, %72 : vector<16x128xf32>
    %cst_21 = arith.constant 0.000000e+00 : f32
    %74 = vector.broadcast %cst_21 : f32 to vector<16x128xf32>
    %75 = arith.maximumf %73, %74 : vector<16x128xf32>
    %c4 = arith.constant 4 : index
    %c0_22 = arith.constant 0 : index
    %76 = vector.load %arg3[%c4, %c0_22] : memref<8x128xf32, #tpu.memory_space<vmem>>, vector<1x128xf32>
    %77 = arith.truncf %75 : vector<16x128xf32> to vector<16x128xbf16>
    %c2_23 = arith.constant 2 : index
    %c0_24 = arith.constant 0 : index
    %c0_25 = arith.constant 0 : index
    %78 = vector.load %arg2[%c2_23, %c0_24, %c0_25] : memref<3x128x128xbf16, #tpu.memory_space<vmem>>, vector<1x128x128xbf16>
    %79 = vector.shape_cast %78 : vector<1x128x128xbf16> to vector<128x128xbf16>
    %cst_26 = arith.constant dense<0.000000e+00> : vector<16x128xf32>
    %80 = tpu.matmul %77, %79, %cst_26 {dimension_numbers = #tpu.dot_dimension_numbers<[1], [0], [0], [1], [0, 0, 1, 1], [], []>} : vector<16x128xbf16>, vector<128x128xbf16>, vector<16x128xf32> -> vector<16x128xf32>
    %81 = vector.broadcast %76 : vector<1x128xf32> to vector<16x128xf32>
    %82 = arith.addf %80, %81 : vector<16x128xf32>
    %c0_27 = arith.constant 0 : index
    %c0_28 = arith.constant 0 : index
    %83 = vector.load %arg4[%c0_27, %c0_28] : memref<16x128xf32, #tpu.memory_space<vmem>>, vector<16x128xf32>
    tpu.vector_store %arg4[%c0_27, %c0_28], %82 {strides = array<i32>} : memref<16x128xf32, #tpu.memory_space<vmem>>, vector<16x128xf32>,
    return
  }
}

</mosaic_0001>

<bundles_post_ra>
// kernel: size_to_hidden_forward.1
= control target key start
LH: loop header
LB: loop body
LE: loop exit
PB: predicated region body
PF: predicated region fallthrough
CT: control target
= control target key end

     0   :  { %10 = vsyncpa [#allocation4], 0  ;;  %s644_s15 = smov [#allocation3]   ;;  %s775_s0 = inlined_call_operand.<no memory space> [shape: s32[1], index: 0, kind: input, shape index: {}]   ;;  %s776_s1 = inlined_call_operand.vmem [shape: f32[16,128], index: 1, kind: input, shape index: {}]   ;;  %s777_s2 = inlined_call_operand.hbm [shape: bf16[3,128,128], index: 2, kind: input, shape index: {}]   ;;  %s778_s3 = inlined_call_operand.vmem [shape: f32[8,128], index: 3, kind: input, shape index: {}]   ;;  %s779_s4 = inlined_call_operand.vmem [shape: f32[16,128], index: 4, kind: output, shape index: {}]  }
   0x1   :  { %s20_s16 = sshll.u32 %s644_s15, 4  ;;  %s620_s19 = scalar_lea.hbm %s777_s2, 3072  ;;  %s21_s16 = int_to_ptr.vmem [resolvable:$true] %s20_s16 }
   0x2   :  { %p621_p0 = scmp.ne.s32.totalorder %s777_s2, %s620_s19  ;;  %p624_p1 = scmp.lt.u32.totalorder %s620_s19, %s777_s2 }
   0x4   :  { %p626_p2 = pnand %p624_p1, %p621_p0 }
   0x6   :  { %629 = shalt.err (!%p626_p2)
}
   0x7   :  { %s630_s24 = scalar_lea.vmem %s21_s16, 3072  ;;  %p635_p4 = scmp.lt.s32.totalorder %s21_s16, %s21_s16 }
   0x8   :  { %p631_p3 = scmp.ne.s32.totalorder %s21_s16, %s630_s24  ;;  %p636_p5 = scmp.lt.s32.totalorder %s630_s24, %s630_s24 }
   0xa   :  { %p637_p6 = por %p636_p5, %p635_p4 }
   0xc   :  { %p638_p7 = pnand %p637_p6, %p631_p3 }
   0xe   :  { %641 = shalt.err (!%p638_p7)
}
   0xf   :  { %s645_s25 = smov 64   ;;  %s646_s26 = smov 4  }
  0x10   :  { %26 = dma.hbm_to_vmem [thread:$0]  %s777_s2, 3072, %s21_s16, [#allocation4], %s645_s25, %s645_s25, %s646_s26  }
  0x11   :  { %642 = dma.done.wait [#allocation4], 3072  }
  0x12   :  { %643 = vsyncadd [#allocation4], 4294964224  ;;  %v647_v0 = vmov 0.0   ;;  %vm648_vm0 = vmmov 0   ;;  %v590_v1 = vld [vmem:[#allocation3] sm:$0xff]   ;;  %v591_v2 = vld [vmem:[#allocation3 + $0x8] sm:$0xff]   ;;  %v36_v20 = vlaneseq  ;;  %v39_v23 = vstv %s775_s0  ;;  %s46_s9 = scvt.s32.f32 %s775_s0 }
  0x13   :  { %525 = vmatprep.subr.bf16.mxu0 %v647_v0  ;;  %541 = vmatprep.mubr.msk.bf16.mxu0 %vm648_vm0, %v647_v0  ;;  %v592_v3 = vld [vmem:[#allocation3 + $0x10] sm:$0xff]   ;;  %v593_v4 = vld [vmem:[#allocation3 + $0x18] sm:$0xff]   ;;  %v594_v5 = vld [vmem:[#allocation3 + $0x20] sm:$0xff]  }
  0x14   :  { %545 = vmatprep.subr.bf16.mxu1 %v647_v0  ;;  %561 = vmatprep.mubr.msk.bf16.mxu1 %vm648_vm0, %v647_v0  ;;  %v595_v6 = vld [vmem:[#allocation3 + $0x28] sm:$0xff]   ;;  %v596_v7 = vld [vmem:[#allocation3 + $0x30] sm:$0xff]   ;;  %v597_v8 = vld [vmem:[#allocation3 + $0x38] sm:$0xff]   ;;  %v37_v21 = vshrl.u32 %v36_v20, 7  ;;  %v47_v30 = vstv %s46_s9 }
  0x15   :  { %526 = vmatpush3.bf16.msra.mxu0 %v590_v1  ;;  %v33_v9 = vld [vmem:[%s776_s1] sm:$0xff]  ;;  %v34_v10 = vld [vmem:[%s776_s1 + $0x8] sm:$0xff]  ;;  %v600_v14 = vld [vmem:[#allocation3 + $0x50] sm:$0xff]   ;;  %614 = vrcp.f32 %v47_v30 }
  0x16   :  { %527 = vmatprep.subr.bf16.mxu0 %v647_v0  ;;  %v51_v11 = vpack.c.bf16 %v34_v10, %v33_v9  ;;  %v598_v12 = vld [vmem:[#allocation3 + $0x40] sm:$0xff]   ;;  %v599_v13 = vld [vmem:[#allocation3 + $0x48] sm:$0xff]   ;;  %v601_v15 = vld [vmem:[#allocation3 + $0x58] sm:$0xff]   ;;  %v38_v22 = vadd.s32 8, %v37_v21  ;;  %vm40_vm1 = vcmp.lt.s32.totalorder %v37_v21, %v39_v23  ;;  %v738_v58 = vsub.s32 0, %v37_v21 }
  0x17   :  { %546 = vmatpush3.bf16.msra.mxu1 %v598_v12  ;;  %v602_v16 = vld [vmem:[#allocation3 + $0x60] sm:$0xff]   ;;  %v603_v17 = vld [vmem:[#allocation3 + $0x68] sm:$0xff]   ;;  %v604_v18 = vld [vmem:[#allocation3 + $0x70] sm:$0xff]   ;;  %v722_v24 = vsel %vm40_vm1, 1.0, %v647_v0 }
  0x18   :  { %547 = vmatprep.subr.bf16.mxu1 %v647_v0  ;;  %v605_v19 = vld [vmem:[#allocation3 + $0x78] sm:$0xff]   ;;  %vm41_vm2 = vcmp.lt.s32.totalorder %v38_v22, %v39_v23  ;;  %v49_v57 = vld [vmem:[%s778_s3] sm:$0x1]  ;;  %v50_v61 = vld [vmem:[%s778_s3 + $0x1] sm:$0x1] }
  0x19   :  { %528 = vmatpush3.bf16.msra.mxu0 %v591_v2  ;;  %v725_v26 = vsel %vm41_vm2, 1.0, %v647_v0  ;;  %v606_v10 = vld [vmem:[#allocation3 + $0x80] sm:$0xff]   ;;  %v608_v12 = vld [vmem:[#allocation3 + $0x90] sm:$0xff]  }
  0x1a   :  { %529 = vmatprep.subr.bf16.mxu0 %v647_v0 }
  0x1b   :  { %548 = vmatpush3.bf16.msra.mxu1 %v599_v13  ;;  %v609_v13 = vld [vmem:[#allocation3 + $0x98] sm:$0xff]  }
  0x1c   :  { %549 = vmatprep.subr.bf16.mxu1 %v647_v0 }
  0x1d   :  { %530 = vmatpush3.bf16.msra.mxu0 %v592_v3 }
  0x1e   :  { %531 = vmatprep.subr.bf16.mxu0 %v647_v0 }
  0x1f   :  { %550 = vmatpush3.bf16.msra.mxu1 %v600_v14  ;;  %v729_v39 = vpop.eup %614  ;;  %v610_v14 = vld [vmem:[#allocation3 + $0xa0] sm:$0xff]  }
  0x20   :  { %551 = vmatprep.subr.bf16.mxu1 %v647_v0 }
  0x21   :  { %532 = vmatpush3.bf16.msra.mxu0 %v593_v4 }
  0x22   :  { %533 = vmatprep.subr.bf16.mxu0 %v647_v0 }
  0x23   :  { %552 = vmatpush3.bf16.msra.mxu1 %v601_v15  ;;  %v611_v15 = vld [vmem:[#allocation3 + $0xa8] sm:$0xff]  }
  0x24   :  { %553 = vmatprep.subr.bf16.mxu1 %v647_v0 }
  0x25   :  { %534 = vmatpush3.bf16.msra.mxu0 %v594_v5 }
  0x26   :  { %535 = vmatprep.subr.bf16.mxu0 %v647_v0 }
  0x27   :  { %554 = vmatpush3.bf16.msra.mxu1 %v602_v16  ;;  %v612_v16 = vld [vmem:[#allocation3 + $0xb0] sm:$0xff]  }
  0x28   :  { %555 = vmatprep.subr.bf16.mxu1 %v647_v0 }
  0x29   :  { %536 = vmatpush3.bf16.msra.mxu0 %v595_v6 }
  0x2a   :  { %537 = vmatprep.subr.bf16.mxu0 %v647_v0 }
  0x2b   :  { %556 = vmatpush3.bf16.msra.mxu1 %v603_v17  ;;  %v613_v17 = vld [vmem:[#allocation3 + $0xb8] sm:$0xff]  }
  0x2c   :  { %557 = vmatprep.subr.bf16.mxu1 %v647_v0 }
  0x2d   :  { %538 = vmatpush3.bf16.msra.mxu0 %v596_v7 }
  0x2e   :  { %539 = vmatprep.subr.bf16.mxu0 %v647_v0 }
  0x2f   :  { %558 = vmatpush3.bf16.msra.mxu1 %v604_v18 }
  0x30   :  { %559 = vmatprep.subr.bf16.mxu1 %v647_v0 }
  0x31   :  { %540 = vmatpush3.bf16.msra.mxu0 %v597_v8 }
  0x32   :  { %565 = vmatprep.subr.bf16.mxu0 %v647_v0 }
  0x33   :  { %560 = vmatpush3.bf16.msra.mxu1 %v605_v19 }
  0x34   :  { %542 = vmatmul.mubr.bf16.vlgmr.msra.gmra.mrb[0].mxu0 %v51_v11  ;;  %v607_v11 = vld [vmem:[#allocation3 + $0x88] sm:$0xff]  }
  0x35   :  { %581 = vmatprep.mubr.msk.bf16.mxu0 %vm648_vm0, %v647_v0  ;;  %566 = vmatpush3.bf16.msra.mxu0 %v606_v10 }
  0x36   :  { %567 = vmatprep.subr.bf16.mxu0 %v647_v0 }
  0x39   :  { %568 = vmatpush3.bf16.msra.mxu0 %v607_v11 }
  0x3a   :  { %569 = vmatprep.subr.bf16.mxu0 %v647_v0 }
  0x3d   :  { %570 = vmatpush3.bf16.msra.mxu0 %v608_v12 }
  0x3e   :  { %571 = vmatprep.subr.bf16.mxu0 %v647_v0 }
  0x41   :  { %572 = vmatpush3.bf16.msra.mxu0 %v609_v13 }
  0x42   :  { %573 = vmatprep.subr.bf16.mxu0 %v647_v0 }
  0x45   :  { %574 = vmatpush3.bf16.msra.mxu0 %v610_v14 }
  0x46   :  { %575 = vmatprep.subr.bf16.mxu0 %v647_v0 }
  0x49   :  { %576 = vmatpush3.bf16.msra.mxu0 %v611_v15 }
  0x4a   :  { %577 = vmatprep.subr.bf16.mxu0 %v647_v0 }
  0x4d   :  { %578 = vmatpush3.bf16.msra.mxu0 %v612_v16 }
  0x4e   :  { %579 = vmatprep.subr.bf16.mxu0 %v647_v0 }
  0x51   :  { %580 = vmatpush3.bf16.msra.mxu0 %v613_v17 }
 0x107   :  { %v150_v25 = vpop.f32.mrb[0].mxu0 }
 0x108   :  { %v543_v27 = vpop.f32.mrb[1].mxu0  ;;  %v157_v29 = vmul.f32 %v722_v24, %v150_v25 }
 0x109   :  { %v153_v28 = vpop.f32.mrb[2].mxu0 }
 0x10a   :  { %v158_v31 = vmul.f32 %v725_v26, %v153_v28  ;;  %v544_v32 = vpop.f32.mrb[3].mxu0 }
 0x10c   :  { %v159_v33 = vadd.f32 %v158_v31, %v157_v29 }
 0x10e   :  { %v160_v34 = vrot.slane %v159_v33, 4 }
 0x110   :  { %v161_v35 = vadd.f32 %v160_v34, %v159_v33 }
 0x112   :  { %v162_v36 = vrot.slane %v161_v35, 2 }
 0x114   :  { %v163_v37 = vadd.f32 %v162_v36, %v161_v35 }
 0x116   :  { %v164_v38 = vrot.slane %v163_v37, 1 }
 0x118   :  { %v165_v40 = vadd.f32 %v164_v38, %v163_v37 }
 0x11a   :  { %v166_v41 = vmul.f32 %v729_v39, %v165_v40 }
 0x11c   :  { %v167_v42 = vsub.f32 %v150_v25, %v166_v41  ;;  %v168_v43 = vsub.f32 %v153_v28, %v166_v41 }
 0x11e   :  { %v169_v44 = vmul.f32 %v722_v24, %v167_v42  ;;  %v170_v45 = vmul.f32 %v725_v26, %v168_v43 }
 0x120   :  { %v171_v46 = vmul.f32 %v169_v44, %v169_v44  ;;  %v172_v47 = vmul.f32 %v170_v45, %v170_v45 }
 0x122   :  { %v173_v48 = vadd.f32 %v172_v47, %v171_v46 }
 0x124   :  { %v174_v49 = vrot.slane %v173_v48, 4 }
 0x126   :  { %v175_v50 = vadd.f32 %v174_v49, %v173_v48  ;;  %v200_v49 = vld [vmem:[%s778_s3 + $0x2] sm:$0x1] }
 0x128   :  { %v176_v51 = vrot.slane %v175_v50, 2 }
 0x12a   :  { %v177_v52 = vadd.f32 %v176_v51, %v175_v50 }
 0x12c   :  { %v178_v53 = vrot.slane %v177_v52, 1 }
 0x12e   :  { %v179_v54 = vadd.f32 %v178_v53, %v177_v52 }
 0x130   :  { %v180_v55 = vmul.f32 %v729_v39, %v179_v54 }
 0x132   :  { %v181_v56 = vadd.f32 1e-05, %v180_v55 }
 0x134   :  { %616 = vrsqrt.f32 %v181_v56 }
 0x13e   :  { %v617_v59 = vpop.eup %616 }
 0x13f   :  { %v183_v60 = vmul.f32 %v617_v59, %v49_v57 }
 0x141   :  { %v184_v62 = vmul.f32 %v183_v60, %v166_v41  ;;  %v189_v63 = vrot.slane %v183_v60, %v738_v58 }
 0x143   :  { %v185_v1 = vsub.f32 %v50_v61, %v184_v62  ;;  %v190_v2 = vmul.f32 %v189_v63, %v150_v25  ;;  %v191_v3 = vmul.f32 %v189_v63, %v153_v28  ;;  %v489_v62 = vld [vmem:[%s778_s3 + $0x4] ss:$0 sm:$0xff] }
 0x145   :  { %v195_v4 = vrot.slane %v185_v1, %v738_v58 }
 0x147   :  { %v197_v5 = vadd.f32 %v195_v4, %v191_v3  ;;  %v196_v6 = vadd.f32 %v195_v4, %v190_v2 }
 0x149   :  { %v198_v7 = vmax.f32 %v196_v6, 0.0  ;;  %v199_v8 = vmax.f32 %v197_v5, 0.0 }
 0x14b   :  { %v202_v9 = vpack.c.bf16 %v199_v8, %v198_v7 }
 0x14d   :  { %562 = vmatmul.mubr.bf16.vlgmr.msra.gmra.mrb[0].mxu1 %v202_v9 }
 0x220   :  { %v302_v18 = vpop.f32.mrb[0].mxu1 }
 0x221   :  { %v563_v19 = vpop.f32.mrb[1].mxu1  ;;  %v309_v21 = vmul.f32 %v722_v24, %v302_v18 }
 0x222   :  { %v305_v20 = vpop.f32.mrb[2].mxu1 }
 0x223   :  { %v310_v22 = vmul.f32 %v725_v26, %v305_v20  ;;  %v564_v23 = vpop.f32.mrb[3].mxu1 }
 0x225   :  { %v311_v25 = vadd.f32 %v310_v22, %v309_v21 }
 0x227   :  { %v312_v27 = vrot.slane %v311_v25, 4 }
 0x229   :  { %v313_v28 = vadd.f32 %v312_v27, %v311_v25 }
 0x22b   :  { %v314_v29 = vrot.slane %v313_v28, 2 }
 0x22d   :  { %v315_v30 = vadd.f32 %v314_v29, %v313_v28 }
 0x22f   :  { %v316_v31 = vrot.slane %v315_v30, 1 }
 0x231   :  { %v317_v32 = vadd.f32 %v316_v31, %v315_v30 }
 0x233   :  { %v318_v33 = vmul.f32 %v729_v39, %v317_v32 }
 0x235   :  { %v319_v0 = vsub.f32 %v302_v18, %v318_v33  ;;  %v320_v34 = vsub.f32 %v305_v20, %v318_v33 }
 0x237   :  { %v321_v35 = vmul.f32 %v722_v24, %v319_v0  ;;  %v322_v36 = vmul.f32 %v725_v26, %v320_v34  ;;  %v201_v26 = vld [vmem:[%s778_s3 + $0x3] sm:$0x1] }
 0x239   :  { %v323_v37 = vmul.f32 %v321_v35, %v321_v35  ;;  %v324_v38 = vmul.f32 %v322_v36, %v322_v36 }
 0x23b   :  { %v325_v40 = vadd.f32 %v324_v38, %v323_v37 }
 0x23d   :  { %v326_v41 = vrot.slane %v325_v40, 4 }
 0x23f   :  { %v327_v42 = vadd.f32 %v326_v41, %v325_v40 }
 0x241   :  { %v328_v43 = vrot.slane %v327_v42, 2 }
 0x243   :  { %v329_v44 = vadd.f32 %v328_v43, %v327_v42 }
 0x245   :  { %v330_v45 = vrot.slane %v329_v44, 1 }
 0x247   :  { %v331_v46 = vadd.f32 %v330_v45, %v329_v44 }
 0x249   :  { %v332_v47 = vmul.f32 %v729_v39, %v331_v46 }
 0x24b   :  { %v333_v48 = vadd.f32 1e-05, %v332_v47 }
 0x24d   :  { %618 = vrsqrt.f32 %v333_v48 }
 0x257   :  { %v619_v24 = vpop.eup %618 }
 0x258   :  { %v335_v50 = vmul.f32 %v619_v24, %v200_v49 }
 0x25a   :  { %v336_v51 = vmul.f32 %v335_v50, %v318_v33  ;;  %v341_v52 = vrot.slane %v335_v50, %v738_v58 }
 0x25c   :  { %v337_v53 = vsub.f32 %v201_v26, %v336_v51  ;;  %v342_v54 = vmul.f32 %v341_v52, %v302_v18  ;;  %v343_v55 = vmul.f32 %v341_v52, %v305_v20 }
 0x25e   :  { %v347_v39 = vrot.slane %v337_v53, %v738_v58 }
 0x260   :  { %v348_v56 = vadd.f32 %v347_v39, %v342_v54  ;;  %v349_v57 = vadd.f32 %v347_v39, %v343_v55 }
 0x262   :  { %v351_v59 = vmax.f32 %v349_v57, 0.0  ;;  %v350_v60 = vmax.f32 %v348_v56, 0.0 }
 0x264   :  { %v353_v61 = vpack.c.bf16 %v351_v59, %v350_v60 }
 0x266   :  { %582 = vmatmul.mubr.bf16.vlgmr.msra.gmra.mrb[4].mxu0 %v353_v61 }
 0x339   :  { %v457_v63 = vpop.f32.mrb[4].mxu0 }
 0x33a   :  { %v458_v1 = vadd.f32 %v489_v62, %v457_v63  ;;  %v583_v2 = vpop.f32.mrb[5].mxu0 }
 0x33b   :  { %v460_v3 = vpop.f32.mrb[6].mxu0 }
 0x33c   :  { %464 = vst [vmem:[%s779_s4] sm:$0xff] %v458_v1  ;;  %v461_v4 = vadd.f32 %v489_v62, %v460_v3  ;;  %v584_v58 = vpop.f32.mrb[7].mxu0 }
 0x33e   :  { %465 = vst [vmem:[%s779_s4 + $0x8] sm:$0xff] %v461_v4 }
 0x33f   :  { %470 = vsyncpa [#allocation4], 1 }

</bundles_post_ra>
